<compile_context>
chip_gen: v5e
topology: v5e:2x2
jax: 0.10.0
libtpu: 0.0.40
codegen_flags: <defaults>
</compile_context>

<pallas_src>
import functools

import jax
import jax.numpy as jnp
from jax.experimental import pallas as pl
from jax.experimental.pallas import tpu as pltpu

_LANE = 128
_MAX_TILE_LANES = 8192
_DEFAULT_VMEM = 64 * 1024 * 1024   # conservative fallback (v7x-sized)


@functools.lru_cache(maxsize=None)
def _vmem_capacity():
    try:
        info = pltpu.get_tpu_info()
        return int(getattr(info, "vmem_capacity_bytes", _DEFAULT_VMEM))
    except Exception:
        return _DEFAULT_VMEM


def _vmem_limit_bytes():
    cap = _vmem_capacity()
    # ~96 MiB on 128 MiB parts (v5e/v6e), ~48 MiB on v7x's 64 MiB, always with headroom.
    return min((3 * cap) // 4, cap - (8 << 20))


def _choose_tile(l_total, rows, in_bytes, n_inputs, n_f32_tmps):
    """Largest power-of-two multiple of 128 lanes whose double-buffered blocks PLUS the
    block-sized f32 temporaries fit the per-generation VMEM live budget; never larger
    than the array extent (tail handled by in-kernel masking, not padding)."""
    if l_total <= _LANE:
        return l_total                       # whole (full-dim) axis in one block
    cap = _vmem_capacity()
    live_budget = (3 * cap) // 8             # ~37.5% of VMEM for live blocks + temps
    per_lane = rows * (2 * n_inputs * in_bytes + n_f32_tmps * 4) + 64
    max_lanes = max(_LANE, live_budget // per_lane)
    tile = _LANE
    while tile * 2 <= min(max_lanes, l_total, _MAX_TILE_LANES):
        tile *= 2
    return tile


# --------------------------------------------------------------------------- kernels


def _diff_reduce_kernel(x_ref, g_ref, o_ref, *, l_total, tile, squared, needs_mask):
    """One (batch, lane-tile) grid instance: sum of |x-g| (or (x-g)^2) over the tile,
    emitted as a lane-dense (1, P) partial."""
    x = x_ref[0].astype(jnp.float32)                      # (R, tile), cast in-kernel
    g = g_ref[0].astype(jnp.float32)
    d = x - g
    v = d * d if squared else jnp.abs(d)
    if needs_mask:
        t = pl.program_id(1)
        limit = l_total - t * tile                        # scalar bound (scalar unit)
        lane = jax.lax.broadcasted_iota(jnp.int32, v.shape, 1)
        v = jnp.where(lane < limit, v, 0.0)               # zero the OOB tail garbage
    row = jnp.sum(v, axis=0, keepdims=True)               # (1, tile) sublane reduce (XLU)
    w = row.shape[1]
    while w > _LANE:                                      # pairwise lane fold -> (1, 128)
        half = w // 2
        row = row[:, :half] + row[:, half:w]
        w = half
    o_ref[0, 0] = row                                     # lane-dense partial store


def _gram_kernel(x_ref, o_ref, acc_ref, *, l_total, tile, inv_scale, needs_mask):
    """Batched Gram matrix: accumulate a (C, C) f32 block over HW tiles on the MXU."""
    k = pl.program_id(1)

    @pl.when(k == 0)
    def _():
        acc_ref[...] = jnp.zeros_like(acc_ref)

    a = x_ref[0].astype(jnp.float32)                      # (C, tile)
    if needs_mask:
        limit = l_total - k * tile
        lane = jax.lax.broadcasted_iota(jnp.int32, a.shape, 1)
        a = jnp.where(lane < limit, a, 0.0)               # zero OOB tail before the dot
    acc_ref[...] += jax.lax.dot_general(                  # a @ a^T on the MXU
        a, a, (((1,), (1,)), ((), ())), preferred_element_type=jnp.float32)

    @pl.when(k == pl.num_programs(1) - 1)
    def _():
        o_ref[0] = acc_ref[...] * jnp.float32(inv_scale)


# ------------------------------------------------------------------------- wrappers


def _sum_reduce(x3, g3, *, squared):
    """sum(|x-g|) or sum((x-g)^2) over a (N, R, L) pair via lane-dense partials."""
    N, R, L = x3.shape
    in_bytes = max(x3.dtype.itemsize, g3.dtype.itemsize)
    tile = _choose_tile(L, R, in_bytes, n_inputs=2, n_f32_tmps=5)
    nt = pl.cdiv(L, tile)
    needs_mask = (L % tile) != 0
    P = min(tile, _LANE)
    kern = functools.partial(_diff_reduce_kernel, l_total=L, tile=tile,
                             squared=squared, needs_mask=needs_mask)
    partials = pl.pallas_call(
        kern,
        out_shape=jax.ShapeDtypeStruct((N, nt, 1, P), jnp.float32),
        grid_spec=pltpu.PrefetchScalarGridSpec(
            num_scalar_prefetch=0,
            grid=(N, nt),
            in_specs=[pl.BlockSpec((1, R, tile), lambda n, t: (n, 0, t)),
                      pl.BlockSpec((1, R, tile), lambda n, t: (n, 0, t))],
            out_specs=pl.BlockSpec((1, 1, 1, P), lambda n, t: (n, t, 0, 0)),
        ),
        compiler_params=pltpu.CompilerParams(
            dimension_semantics=("parallel", "parallel"),
            vmem_limit_bytes=_vmem_limit_bytes(),
        ),
    )(x3, g3)
    return jnp.sum(partials, dtype=jnp.float32)


def _gram(x):
    """gram(x) = x.view(N,C,HW) @ x.view(N,C,HW)^T / (C*H*W), accumulated in f32."""
    N, C, H, W = x.shape
    L = H * W
    x3 = x.reshape(N, C, L)
    tile = _choose_tile(L, C, x3.dtype.itemsize, n_inputs=1, n_f32_tmps=3)
    kt = pl.cdiv(L, tile)
    needs_mask = (L % tile) != 0
    kern = functools.partial(_gram_kernel, l_total=L, tile=tile,
                             inv_scale=1.0 / float(C * H * W), needs_mask=needs_mask)
    return pl.pallas_call(
        kern,
        out_shape=jax.ShapeDtypeStruct((N, C, C), jnp.float32),
        grid_spec=pltpu.PrefetchScalarGridSpec(
            num_scalar_prefetch=0,
            grid=(N, kt),
            in_specs=[pl.BlockSpec((1, C, tile), lambda n, k: (n, 0, k))],
            out_specs=pl.BlockSpec((1, C, C), lambda n, k: (n, 0, 0)),
            scratch_shapes=[pltpu.VMEM((C, C), jnp.float32)],
        ),
        compiler_params=pltpu.CompilerParams(
            dimension_semantics=("parallel", "arbitrary"),
            vmem_limit_bytes=_vmem_limit_bytes(),
        ),
    )(x3)


def _layer_criterion(a, b, criterion):
    """criterion(a, b) on same-shape (N, R, L)-viewable tensors."""
    N = a.shape[0]
    a3 = a.reshape(N, a.shape[1], -1)
    b3 = b.reshape(N, b.shape[1], -1)
    s = _sum_reduce(a3, b3, squared=(criterion == "fro"))
    if criterion == "fro":
        return jnp.sqrt(s)                    # torch.norm(a - b, p='fro')
    return s / jnp.float32(a3.size)           # torch.nn.L1Loss (mean)


def perceptual_loss(x_features, gt_features, layer_weights, *,
                    perceptual_weight=1.0, style_weight=0.0, criterion="l1"):
    """PerceptualLoss.forward, given the per-layer VGG features of x and gt.

    Returns (percep_loss, style_loss) exactly like the PyTorch module (None when the
    corresponding weight is 0)."""
    if criterion not in ("l1", "fro"):
        # 'l2' in the original references a nonexistent torch.nn.L2loss; not supported.
        raise NotImplementedError(f"{criterion} criterion has not been supported.")
    gt_features = jax.tree_util.tree_map(jax.lax.stop_gradient, gt_features)  # .detach()

    percep_loss = None
    if perceptual_weight > 0:
        percep_loss = jnp.float32(0.0)
        for k in x_features.keys():
            percep_loss = percep_loss + (
                _layer_criterion(x_features[k], gt_features[k], criterion)
                * float(layer_weights[k]))
        percep_loss = percep_loss * jnp.float32(perceptual_weight)

    style_loss = None
    if style_weight > 0:
        style_loss = jnp.float32(0.0)
        for k in x_features.keys():
            gx = _gram(x_features[k])
            gg = _gram(gt_features[k])
            style_loss = style_loss + (
                _layer_criterion(gx, gg, criterion) * float(layer_weights[k]))
        style_loss = style_loss * jnp.float32(style_weight)

    return percep_loss, style_loss


# ------------------------------------------------------------------ pure-JAX reference


def _reference(x_features, gt_features, layer_weights, perceptual_weight,
               style_weight, criterion):
    def gram(x):
        n, c, h, w = x.shape
        f = x.reshape(n, c, h * w).astype(jnp.float32)
        return jnp.einsum("ncl,ndl->ncd", f, f) / (c * h * w)

    def crit(a, b):
        d = a.astype(jnp.float32) - b.astype(jnp.float32)
        if criterion == "fro":
            return jnp.sqrt(jnp.sum(d * d))
        return jnp.mean(jnp.abs(d))

    percep = jnp.float32(0.0)
    for k in x_features:
        percep = percep + crit(x_features[k], gt_features[k]) * layer_weights[k]
    percep = percep * perceptual_weight
    style = jnp.float32(0.0)
    for k in x_features:
        style = style + crit(gram(x_features[k]), gram(gt_features[k])) * layer_weights[k]
    style = style * style_weight
    return percep, style


if __name__ == "__main__":
    key = jax.random.PRNGKey(0)
    k = jax.random.split(key, 6)

    # Raw module inputs would be (2, 1, 16, 16) images -> repeat_interleave(3, dim=1)
    # -> pretrained VGG19 features.  The VGG tower is out of scope (see TODO at top);
    # the kernels consume small VGG-like per-layer feature maps directly.
    layer_weights = {"conv1_2": 0.5, "conv2_2": 1.0}
    x_features = {
        "conv1_2": jax.random.normal(k[0], (2, 8, 16, 16), dtype=jnp.float32),
        "conv2_2": jax.random.normal(k[1], (2, 16, 8, 8), dtype=jnp.float32),
    }
    gt_features = {
        "conv1_2": jax.random.normal(k[2], (2, 8, 16, 16), dtype=jnp.float32),
        "conv2_2": jax.random.normal(k[3], (2, 16, 8, 8), dtype=jnp.float32),
    }

    # Default 'l1' criterion, with both perceptual and style losses enabled.
    percep, style = perceptual_loss(x_features, gt_features, layer_weights,
                                    perceptual_weight=1.0, style_weight=0.5,
                                    criterion="l1")
    percep, style = jax.block_until_ready((percep, style))
    ref_p, ref_s = _reference(x_features, gt_features, layer_weights, 1.0, 0.5, "l1")
    assert jnp.allclose(percep, ref_p, rtol=1e-5, atol=1e-5), (percep, ref_p)
    assert jnp.allclose(style, ref_s, rtol=1e-5, atol=1e-5), (style, ref_s)

    # 'fro' criterion + a non-128-aligned spatial size (exercises the in-kernel
    # tail-tile masking in both the reduction and the Gram accumulation).
    layer_weights2 = {"conv3_1": 1.0}
    xf2 = {"conv3_1": jax.random.normal(k[4], (2, 16, 12, 15), dtype=jnp.float32)}
    gf2 = {"conv3_1": jax.random.normal(k[5], (2, 16, 12, 15), dtype=jnp.float32)}
    p2, s2 = perceptual_loss(xf2, gf2, layer_weights2, perceptual_weight=2.0,
                             style_weight=1.0, criterion="fro")
    p2, s2 = jax.block_until_ready((p2, s2))
    rp2, rs2 = _reference(xf2, gf2, layer_weights2, 2.0, 1.0, "fro")
    assert jnp.allclose(p2, rp2, rtol=1e-5, atol=1e-5), (p2, rp2)
    assert jnp.allclose(s2, rs2, rtol=1e-5, atol=1e-5), (s2, rs2)

    print("KERNEL_OK")
</pallas_src>

<mosaic_0001>
module attributes {stable_mosaic.version = 11 : i64} {
  func.func @_diff_reduce_kernel(%arg0: i32, %arg1: i32, %arg2: memref<1x8x256xf32, #tpu.memory_space<vmem>>, %arg3: memref<1x8x256xf32, #tpu.memory_space<vmem>>, %arg4: memref<1x1x1x128xf32, #tpu.memory_space<vmem>>) attributes {dimension_semantics = [#tpu.dimension_semantics<parallel>, #tpu.dimension_semantics<parallel>], iteration_bounds = array<i64: 2, 1>, scalar_prefetch = 0 : i64, scratch_operands = 0 : i64, tpu.core_type = #tpu.core_type<tc>, window_params = [{transform_indices = @transform_0, window_bounds = array<i64: 1, 8, 256>}, {transform_indices = @transform_1, window_bounds = array<i64: 1, 8, 256>}, {transform_indices = @transform_2, window_bounds = array<i64: 1, 1, 1, 128>}]} {
    %c0 = arith.constant 0 : index
    %c0_0 = arith.constant 0 : index
    %c0_1 = arith.constant 0 : index
    %0 = vector.load %arg2[%c0, %c0_0, %c0_1] : memref<1x8x256xf32, #tpu.memory_space<vmem>>, vector<1x8x256xf32>
    %1 = vector.shape_cast %0 : vector<1x8x256xf32> to vector<8x256xf32>
    %c0_2 = arith.constant 0 : index
    %c0_3 = arith.constant 0 : index
    %c0_4 = arith.constant 0 : index
    %2 = vector.load %arg3[%c0_2, %c0_3, %c0_4] : memref<1x8x256xf32, #tpu.memory_space<vmem>>, vector<1x8x256xf32>
    %3 = vector.shape_cast %2 : vector<1x8x256xf32> to vector<8x256xf32>
    %4 = arith.subf %1, %3 : vector<8x256xf32>
    %5 = math.absf %4 : vector<8x256xf32>
    %cst = arith.constant dense<0.000000e+00> : vector<256xf32>
    %6 = vector.multi_reduction <add>, %5, %cst [0] : vector<8x256xf32> to vector<256xf32>
    %7 = vector.shape_cast %6 : vector<256xf32> to vector<1x256xf32>
    %8 = vector.extract_strided_slice %7 {offsets = [0, 0], sizes = [1, 128], strides = [1, 1]} : vector<1x256xf32> to vector<1x128xf32>
    %9 = vector.extract_strided_slice %7 {offsets = [0, 128], sizes = [1, 128], strides = [1, 1]} : vector<1x256xf32> to vector<1x128xf32>
    %10 = arith.addf %8, %9 : vector<1x128xf32>
    %c0_5 = arith.constant 0 : index
    %c0_6 = arith.constant 0 : index
    %c0_7 = arith.constant 0 : index
    %c0_8 = arith.constant 0 : index
    %11 = vector.load %arg4[%c0_5, %c0_6, %c0_7, %c0_8] : memref<1x1x1x128xf32, #tpu.memory_space<vmem>>, vector<1x1x1x128xf32>
    %12 = vector.shape_cast %11 : vector<1x1x1x128xf32> to vector<1x128xf32>
    %13 = vector.shape_cast %10 : vector<1x128xf32> to vector<1x1x1x128xf32>
    tpu.vector_store %arg4[%c0_5, %c0_6, %c0_7, %c0_8], %13 {strides = array<i32>} : memref<1x1x1x128xf32, #tpu.memory_space<vmem>>, vector<1x1x1x128xf32>,
    return
  }
  func.func @transform_0(%arg0: i32, %arg1: i32) -> (i32, i32, i32) {
    %c0_i32 = arith.constant 0 : i32
    %c0_i32_0 = arith.constant 0 : i32
    return %arg0, %c0_i32, %arg1 : i32, i32, i32
  }
  func.func @transform_1(%arg0: i32, %arg1: i32) -> (i32, i32, i32) {
    %c0_i32 = arith.constant 0 : i32
    %c0_i32_0 = arith.constant 0 : i32
    return %arg0, %c0_i32, %arg1 : i32, i32, i32
  }
  func.func @transform_2(%arg0: i32, %arg1: i32) -> (i32, i32, i32, i32) {
    %c0_i32 = arith.constant 0 : i32
    %c0_i32_0 = arith.constant 0 : i32
    %c0_i32_1 = arith.constant 0 : i32
    return %arg0, %arg1, %c0_i32, %c0_i32_0 : i32, i32, i32, i32
  }
}

</mosaic_0001>

<bundles_post_ra>
// kernel: tpu_custom_call.1
= control target key start
LH: loop header
LB: loop body
LE: loop exit
PB: predicated region body
PF: predicated region fallthrough
CT: control target
= control target key end

     0   :  { %7 = vsyncpa [#allocation3], 0  ;;  %s741_s0 = inlined_call_operand.hbm [shape: f32[2,8,256], index: 0, kind: input, shape index: {}]   ;;  %s742_s1 = inlined_call_operand.hbm [shape: f32[2,8,256], index: 1, kind: input, shape index: {}]   ;;  %s743_s2 = inlined_call_operand.hbm [shape: f32[2,1,1,128], index: 2, kind: output, shape index: {}]  }
   0x1   :  { %9 = vsyncpa [#allocation3 + $0x1], 0 }
   0x2   :  { %10 = vsyncpa [#allocation6], 0 }
   0x3   :  { %12 = vsyncpa [#allocation6 + $0x1], 0 }
   0x4   :  { %13 = vsyncpa [#allocation4], 0 }
   0x5   :  { %15 = vsyncpa [#allocation4 + $0x1], 0  ;;  %s612_s9 = smov 0   ;;  %s614_s10 = smov 0  }
   0x6   :  { %s616_s11 = smov 0   ;;  %s618_s12 = smov 0  }
   0x7   :  { %s620_s13 = smov 0   ;;  %s622_s14 = smov 0  }
   0x8 LB: > { %s365_s15 = sadd.s32 4294967295, %s595_s14   ;;  %s366_s16 = sadd.s32 4294967294, %s595_s14   ;;  %s595_s14 = sphi %s622_s14, %s21_s14   ;;  %s591_s13 = sphi %s620_s13, %s752_s13   ;;  %s587_s12 = sphi %s618_s12, %s751_s12   ;;  %s583_s11 = sphi %s616_s11, %s750_s11   ;;  %s579_s10 = sphi %s614_s10, %s749_s10   ;;  %s575_s9 = sphi %s612_s9, %s748_s9  }
   0x9   : > { %s33_s17 = sadd.s32 1, %s591_s13  ;;  %s42_s18 = sadd.s32 1, %s583_s11 }
   0xa   : > { %p35_p0 = scmp.ge.s32.totalorder %s33_s17, 2  ;;  %p49_p1 = scmp.ne.s32.totalorder %s583_s11, %s579_s10 }
   0xb   : > { %p50_p2 = scmp.eq.s32.totalorder %s595_s14, 0  ;;  %p55_p3 = scmp.ne.s32.totalorder %s579_s10, %s575_s9 }
   0xc   : > { %s754_s17 = smov (%p35_p0, %s33_s17), 0  ;;  %p56_p5 = scmp.eq.s32.totalorder %s365_s15, 0 }
   0xd   : > { %p653_p4 = por %p50_p2, %p49_p1  ;;  %s37_s20 = ssub.s32 %s591_s13, %s754_s17 }
   0xe   : > { %p109_p6 = scmp.eq.s32.totalorder %s365_s15, 1  ;;  %p40_p7 = scmp.eq.s32.totalorder %s37_s20, 0 }
   0xf   : > { %p659_p8 = por %p56_p5, %p55_p3  ;;  %p115_p10 = scmp.eq.s32.totalorder %s366_s16, 1 }
  0x10   : > { %p663_p9 = por %p109_p6, %p49_p1  ;;  %p368_p12 = scmp.ge.s32.totalorder %s595_s14, 2 }
  0x11   : > { %s668_s23 = scalar_select %p40_p7, %s583_s11, %s42_s18  }
  0x12   : > { %p670_p11 = por %p115_p10, %p55_p3  ;;  %p399_p13 = scmp.lt.s32.totalorder %s595_s14, 2 }
  0x13   : > { %s135_s25 = sand.u32 1, %s583_s11   ;;  %s380_s27 = sshll.u32 %s591_s13, 4 }
  0x14   : > { %s369_s26 = sshll.u32 %s135_s25, 4  ;;  %s146_s30 = scalar_lea.hbm %s741_s0, %s380_s27 }
  0x15   : > { %s139_s3 = scalar_lea.vmem [#allocation2], %s369_s26  ;;  %s148_s5 = sshll.u32 %s146_s30, 4  ;;  %s149_s5 = int_to_ptr.hbm [resolvable:$true] %s148_s5 }
  0x16   : > { %s150_s4 = sshll.u32 %s139_s3, 4  ;;  %p389_p0 = pnand %p399_p13, %p653_p4  ;;  %s151_s4 = int_to_ptr.vmem [resolvable:$true] %s150_s4 }
  0x17   : > { %p375_p1 = scmp.ge.s32.totalorder %s595_s14, 1  ;;  %p177_p2 = scmp.lt.s32.totalorder %s595_s14, 3 }
  0x18   : > { %s136_s6 = scalar_lea.sflag [#allocation3], %s135_s25  ;;  %s168_s15 = scalar_lea.hbm %s742_s1, %s380_s27 }
  0x19   : > { %391 = dma.hbm_to_vmem [thread:$0]  (!%p389_p0), %s149_s5, 256, %s151_s4, %s136_s6  }
  0x1a   : > { %p178_p3 = pnand %p375_p1, %p177_p2  ;;  %s161_s16 = scalar_lea.vmem [#allocation5], %s369_s26 }
  0x1b   : > { %s172_s18 = sshll.u32 %s161_s16, 4  ;;  %s170_s20 = sshll.u32 %s168_s15, 4  ;;  %s173_s18 = int_to_ptr.vmem [resolvable:$true] %s172_s18  ;;  %s171_s20 = int_to_ptr.hbm [resolvable:$true] %s170_s20 }
  0x1c   : > { %s158_s28 = scalar_lea.sflag [#allocation6], %s135_s25  ;;  %181 = sbr.rel (%p178_p3) target bundleno = 59 (0x3b), region = 28 }
  0x1d   : > { %394 = dma.hbm_to_vmem [thread:$0]  (!%p389_p0), %s171_s20, 256, %s173_s18, %s158_s28  }
  0x1e   : > { %s689_s19 = sand.u32 (!%p178_p3), 1, %s579_s10  }
  0x1f   : > { %s376_s29 = sshll.u32 (!%p178_p3), %s689_s19, 4  ;;  %s184_s30 = scalar_lea.sflag (!%p178_p3), [#allocation3], %s689_s19 }
  0x20   : > { %s187_s3 = scalar_lea.vmem (!%p178_p3), [#allocation2], %s376_s29 }
  0x21   : > { %562 = dma.done.wait (%p659_p8), %s184_s30, 256  }
  0x22   : > { %564 = vsyncadd (%p659_p8), %s184_s30, 4294967040  ;;  %s194_s26 = scalar_lea.sflag [#allocation6], %s689_s19  ;;  %s197_s25 = scalar_lea.vmem [#allocation5], %s376_s29 }
  0x23   : > { %566 = dma.done.wait (%p659_p8), %s194_s26, 256  }
  0x24   : > { %568 = vsyncadd (%p659_p8), %s194_s26, 4294967040  ;;  %v225_v0 = vld [vmem:[%s187_s3] sm:$0xff]  ;;  %v226_v1 = vld [vmem:[%s187_s3 + $0x8] sm:$0xff]  ;;  %s257_s4 = scalar_lea.hbm %s743_s2, %s587_s12  ;;  %s222_s5 = scalar_lea.vmem [#allocation7], %s689_s19 }
  0x25   : > { %v227_v2 = vld [vmem:[%s197_s25] sm:$0xff]  ;;  %v228_v3 = vld [vmem:[%s197_s25 + $0x8] sm:$0xff]  ;;  %s259_s6 = sshll.u32 %s222_s5, 4  ;;  %s261_s7 = sshll.u32 %s257_s4, 4  ;;  %s260_s6 = int_to_ptr.vmem [resolvable:$true] %s259_s6  ;;  %s262_s7 = int_to_ptr.hbm [resolvable:$true] %s261_s7 }
  0x26   : > { %v229_v4 = vsub.f32 %v225_v0, %v227_v2  ;;  %v230_v5 = vsub.f32 %v226_v1, %v228_v3  ;;  %s248_s8 = scalar_lea.sflag [#allocation4], %s689_s19  ;;  %s523_s15 = sshra.s32 %s262_s7, 4  ;;  %s524_s15 = int_to_ptr.hbm [resolvable:$true] %s523_s15 }
  0x27   : > { %s525_s16 = scalar_lea.hbm %s524_s15, 1  ;;  %s529_s20 = scalar_lea.hbm %s743_s2, 2 }
  0x28   : > { %v231_v6 = vand.u32 2147483647, %v229_v4  ;;  %v232_v7 = vand.u32 2147483647, %v230_v5  ;;  %p526_p4 = scmp.ne.s32.totalorder %s524_s15, %s525_s16  ;;  %p530_p7 = scmp.lt.s32.totalorder %s524_s15, %s743_s2 }
  0x29   : > { %p531_p8 = scmp.lt.s32.totalorder %s529_s20, %s525_s16 }
  0x2a   : > { %v233_v8 = vrot.slane %v231_v6, 4  ;;  %v239_v9 = vrot.slane %v232_v7, 4  ;;  %p527_p5 = pnand %p526_p4, %p663_p9 }
  0x2b   : > { %p532_p10 = por %p531_p8, %p530_p7 }
  0x2c   : > { %v234_v10 = vadd.f32 %v233_v8, %v231_v6  ;;  %v240_v11 = vadd.f32 %v239_v9, %v232_v7  ;;  %p528_p6 = pneg %p527_p5 }
  0x2e   : > { %v235_v12 = vrot.slane %v234_v10, 2  ;;  %v241_v13 = vrot.slane %v240_v11, 2  ;;  %p533_p13 = pnand %p532_p10, %p528_p6 }
  0x30   : > { %v236_v14 = vadd.f32 %v235_v12, %v234_v10  ;;  %v242_v15 = vadd.f32 %v241_v13, %v240_v11 }
  0x32   : > { %v237_v16 = vrot.slane %v236_v14, 1  ;;  %v243_v17 = vrot.slane %v242_v15, 1 }
  0x34   : > { %v238_v18 = vadd.f32 %v237_v16, %v236_v14  ;;  %v244_v19 = vadd.f32 %v243_v17, %v242_v15 }
  0x36   : > { %v245_v20 = vadd.f32 %v244_v19, %v238_v18 }
  0x38   : > { %246 = vst [vmem:[%s222_s5] sm:$0x1] %v245_v20 }
  0x39   : > { %536 = shalt.err (!%p533_p13)
}
  0x3a   : > { %386 = dma.vmem_to_hbm [thread:$0]  (%p663_p9), %s260_s6, 16, %s262_s7, %s248_s8  }
  0x3b PF: > { %s273_s19 = sand.u32 1, %s575_s9   ;;  %p396_p0 = pnand %p368_p12, %p670_p11 }
  0x3c   : > { %s274_s30 = scalar_lea.sflag [#allocation4], %s273_s19 }
  0x3d   : > { %p397_p1 = pneg %p396_p0 }
  0x3f   : > { %570 = dma.done.wait (%p397_p1), %s274_s30, 16  }
  0x40   : > { %572 = vsyncadd (%p397_p1), %s274_s30, 4294967280  ;;  %s21_s14 = sadd.s32 1, %s595_s14   ;;  %s748_s9 = smov %s579_s10 }
  0x41   : > { %p18_p2 = scmp.ge.s32.totalorder %s21_s14, 4   ;;  %s749_s10 = smov %s583_s11 }
  0x42   : > { %s750_s11 = smov %s668_s23  ;;  %s751_s12 = smov %s591_s13 }
  0x43   : > { %s752_s13 = smov %s754_s17  ;;  %20 = sbr.rel (!%p18_p2) target bundleno = 8 (0x8), region = 86 }
  0x48   :  { %279 = vsyncpa [#allocation3], 1 }
  0x49   :  { %281 = vsyncpa [#allocation3 + $0x1], 1 }
  0x4a   :  { %282 = vsyncpa [#allocation6], 1 }
  0x4b   :  { %284 = vsyncpa [#allocation6 + $0x1], 1 }
  0x4c   :  { %285 = vsyncpa [#allocation4], 1 }
  0x4d   :  { %287 = vsyncpa [#allocation4 + $0x1], 1 }

</bundles_post_ra>
